<compile_context>
chip_gen: v5e
topology: v5e:2x2
jax: 0.10.0
libtpu: 0.0.40
codegen_flags: <defaults>
</compile_context>

<pallas_src>
import numpy as np
import jax
import jax.numpy as jnp
from jax.experimental import pallas as pl
from jax.experimental.pallas import tpu as pltpu


def _round_up(x, m):
    return ((x + m - 1) // m) * m


def _make_conv_block_kernel(C_in, C_out, kh, kw, stride, Wh, Lout,
                            inv_count, eps, negative_slope):
    """Per-sample kernel: tap-accumulated conv + InstanceNorm + LeakyReLU."""

    def kernel(x_ref, w_ref, mask_ref, o_ref):
        # x_ref:    (1, stride*stride, C_in, Lpad) bf16  parity groups, flat (Hh*Wh)+pad
        # w_ref:    (kh*kw, C_out, C_in)           bf16  one (C_out, C_in) matrix per tap
        # mask_ref: (1, Lout)                      f32   1.0 on valid output lanes
        # o_ref:    (1, C_out, Lout)               f32   lane-dense output slab
        acc = jnp.zeros((C_out, Lout), dtype=jnp.float32)
        for i in range(kh):
            for j in range(kw):
                g = (i % stride) * stride + (j % stride)
                shift = (i // stride) * Wh + (j // stride)
                tap = x_ref[0, g, :, pl.ds(shift, Lout)]        # (C_in, Lout) bf16
                w_tap = w_ref[i * kw + j]                       # (C_out, C_in) bf16
                acc = acc + jnp.dot(w_tap, tap,
                                    preferred_element_type=jnp.float32)

        # InstanceNorm2d(affine=False), single pass: masked sum / sum-of-squares (f32).
        mask = mask_ref[...]                                    # (1, Lout)
        s1 = jnp.sum(acc * mask, axis=1, keepdims=True)         # (C_out, 1)
        s2 = jnp.sum(acc * acc * mask, axis=1, keepdims=True)
        mean = s1 * inv_count
        var = jnp.maximum(s2 * inv_count - mean * mean, 0.0)
        y = (acc - mean) * jax.lax.rsqrt(var + eps)             # rsqrt -> EUP slot

        # LeakyReLU(0.2)
        o_ref[0] = jnp.where(y >= 0, y, negative_slope * y)

    return kernel


def conv_block_forward(x, weight, bias=None, stride=2, eps=1e-5, negative_slope=0.2):
    """x: (N, C_in, H, W) f32; weight: (C_out, C_in, 4, 4); bias accepted but unused
    (a per-channel constant is cancelled exactly by the InstanceNorm mean subtraction)."""
    del bias
    N, C_in, H, W = x.shape
    C_out, C_in_w, kh, kw = weight.shape
    assert C_in_w == C_in
    Hp, Wp = H + 2, W + 2
    assert Hp % stride == 0 and Wp % stride == 0, "padded H/W must divide stride"
    Hh, Wh = Hp // stride, Wp // stride
    Ho = (Hp - kh) // stride + 1
    Wo = (Wp - kw) // stride + 1

    # Flat-spatial geometry: output pixel (ho, wo) lives at lane ho*Wh + wo; conv tap
    # (i, j) reads parity group (i % s, j % s) shifted by (i//s)*Wh + (j//s) lanes.
    L = Ho * Wh
    Lout = _round_up(L, 128)                          # lane-dense output slab width
    max_shift = ((kh - 1) // stride) * Wh + ((kw - 1) // stride)
    Lpad = _round_up(max_shift + Lout, 128)

    # --- glue: reflect pad + space-to-depth into stride*stride parity groups (bf16) ---
    xp = jnp.pad(x, ((0, 0), (0, 0), (1, 1), (1, 1)), mode="reflect")
    xg = xp.astype(jnp.bfloat16).reshape(N, C_in, Hh, stride, Wh, stride)
    xg = jnp.transpose(xg, (0, 3, 5, 1, 2, 4))        # (N, s, s, C_in, Hh, Wh)
    xg = xg.reshape(N, stride * stride, C_in, Hh * Wh)
    xg = jnp.pad(xg, ((0, 0), (0, 0), (0, 0), (0, Lpad - Hh * Wh)))

    # Per-tap weight matrices (kh*kw, C_out, C_in), bf16 for the MXU.
    w_taps = jnp.transpose(weight, (2, 3, 0, 1)).reshape(kh * kw, C_out, C_in)
    w_taps = w_taps.astype(jnp.bfloat16)

    # Validity mask over padded flat lanes (phantom column wo == Wh-1 and lane-pad tail).
    lane = np.arange(Lout)
    mask = ((lane < L) & (lane % Wh < Wo)).astype(np.float32).reshape(1, Lout)
    mask = jnp.asarray(mask)

    kernel = _make_conv_block_kernel(C_in, C_out, kh, kw, stride, Wh, Lout,
                                     inv_count=1.0 / float(Ho * Wo), eps=eps,
                                     negative_slope=negative_slope)

    # TODO(synk): at production resolutions, add a grid axis tiling the flat spatial
    # dim ("arbitrary") with two-pass instance-norm stats in VMEM scratch so blocks fit
    # v7x's 64 MiB VMEM and the tap matmuls overlap the next tile's DMA.
    out = pl.pallas_call(
        kernel,
        out_shape=jax.ShapeDtypeStruct((N, C_out, Lout), jnp.float32),
        grid=(N,),
        in_specs=[
            pl.BlockSpec((1, stride * stride, C_in, Lpad), lambda n: (n, 0, 0, 0)),
            pl.BlockSpec((kh * kw, C_out, C_in), lambda n: (0, 0, 0)),
            pl.BlockSpec((1, Lout), lambda n: (0, 0)),
        ],
        out_specs=pl.BlockSpec((1, C_out, Lout), lambda n: (n, 0, 0)),
        compiler_params=pltpu.CompilerParams(
            dimension_semantics=("parallel",),
            vmem_limit_bytes=64 * 1024 * 1024,
        ),
    )(xg, w_taps, mask)

    # Lane-dense (C_out, flat) slab is already channel-major: drop the phantom column
    # and lane padding, reshape straight to NCHW (no transpose).
    out = out[:, :, :L].reshape(N, C_out, Ho, Wh)[:, :, :, :Wo]
    return out


def conv_block_reference(x, weight, bias, stride=2, eps=1e-5, negative_slope=0.2):
    """Pure-JAX f32 reference (faithful to the PyTorch module, bias included)."""
    xp = jnp.pad(x, ((0, 0), (0, 0), (1, 1), (1, 1)), mode="reflect")
    y = jax.lax.conv_general_dilated(
        xp, weight, (stride, stride), "VALID",
        dimension_numbers=("NCHW", "OIHW", "NCHW"),
    )
    y = y + bias.reshape(1, -1, 1, 1)
    mean = jnp.mean(y, axis=(2, 3), keepdims=True)
    var = jnp.mean((y - mean) ** 2, axis=(2, 3), keepdims=True)
    y = (y - mean) / jnp.sqrt(var + eps)
    return jnp.where(y >= 0, y, negative_slope * y)


if __name__ == "__main__":
    # ConvBlock(in_channels=4, out_channels=8, stride=2) on a (2, 4, 16, 16) input
    N, C_in, C_out, H, W = 2, 4, 8, 16, 16
    key = jax.random.PRNGKey(0)
    kx, kw_, kb = jax.random.split(key, 3)

    x = jax.random.normal(kx, (N, C_in, H, W), dtype=jnp.float32)
    weight = 0.1 * jax.random.normal(kw_, (C_out, C_in, 4, 4), dtype=jnp.float32)
    bias = 0.1 * jax.random.normal(kb, (C_out,), dtype=jnp.float32)

    fwd = jax.jit(lambda xx, ww, bb: conv_block_forward(xx, ww, bb, stride=2))
    out = jax.block_until_ready(fwd(x, weight, bias))

    ref = conv_block_reference(x, weight, bias, stride=2)
    # bf16 MXU inputs (f32 accumulate / norm) vs. full-f32 reference -> bf16 tolerance.
    np.testing.assert_allclose(np.asarray(out), np.asarray(ref), atol=5e-2, rtol=5e-2)
    assert out.shape == (N, C_out, H // 2, W // 2)

    print("KERNEL_OK")
</pallas_src>

<mosaic_0001>
module attributes {stable_mosaic.version = 11 : i64} {
  func.func @kernel(%arg0: i32, %arg1: memref<1x4x4x256xbf16, #tpu.memory_space<vmem>>, %arg2: memref<16x8x4xbf16, #tpu.memory_space<vmem>>, %arg3: memref<1x128xf32, #tpu.memory_space<vmem>>, %arg4: memref<1x8x128xf32, #tpu.memory_space<vmem>>) attributes {dimension_semantics = [#tpu.dimension_semantics<parallel>], iteration_bounds = array<i64: 2>, scalar_prefetch = 0 : i64, scratch_operands = 0 : i64, tpu.core_type = #tpu.core_type<tc>, window_params = [{transform_indices = @transform_0, window_bounds = array<i64: 1, 4, 4, 256>}, {pipeline_mode = #tpu.pipeline_mode<synchronous>, transform_indices = @transform_1, window_bounds = array<i64: 16, 8, 4>}, {pipeline_mode = #tpu.pipeline_mode<synchronous>, transform_indices = @transform_2, window_bounds = array<i64: 1, 128>}, {transform_indices = @transform_3, window_bounds = array<i64: 1, 8, 128>}]} {
    %cst = arith.constant 0.000000e+00 : f32
    %0 = vector.broadcast %cst : f32 to vector<8x128xf32>
    %c0 = arith.constant 0 : index
    %c0_0 = arith.constant 0 : index
    %c0_1 = arith.constant 0 : index
    %c0_2 = arith.constant 0 : index
    %1 = vector.load %arg1[%c0, %c0_0, %c0_1, %c0_2] : memref<1x4x4x256xbf16, #tpu.memory_space<vmem>>, vector<1x1x4x128xbf16>
    %2 = vector.shape_cast %1 : vector<1x1x4x128xbf16> to vector<4x128xbf16>
    %c0_3 = arith.constant 0 : index
    %c0_4 = arith.constant 0 : index
    %c0_5 = arith.constant 0 : index
    %3 = vector.load %arg2[%c0_3, %c0_4, %c0_5] : memref<16x8x4xbf16, #tpu.memory_space<vmem>>, vector<1x8x4xbf16>
    %4 = vector.shape_cast %3 : vector<1x8x4xbf16> to vector<8x4xbf16>
    %cst_6 = arith.constant dense<0.000000e+00> : vector<8x128xf32>
    %5 = tpu.matmul %4, %2, %cst_6 {dimension_numbers = #tpu.dot_dimension_numbers<[1], [0], [0], [1], [0, 0, 1, 1], [], []>} : vector<8x4xbf16>, vector<4x128xbf16>, vector<8x128xf32> -> vector<8x128xf32>
    %6 = arith.addf %0, %5 : vector<8x128xf32>
    %c0_7 = arith.constant 0 : index
    %c1 = arith.constant 1 : index
    %c0_8 = arith.constant 0 : index
    %c0_9 = arith.constant 0 : index
    %7 = vector.load %arg1[%c0_7, %c1, %c0_8, %c0_9] : memref<1x4x4x256xbf16, #tpu.memory_space<vmem>>, vector<1x1x4x128xbf16>
    %8 = vector.shape_cast %7 : vector<1x1x4x128xbf16> to vector<4x128xbf16>
    %c1_10 = arith.constant 1 : index
    %c0_11 = arith.constant 0 : index
    %c0_12 = arith.constant 0 : index
    %9 = vector.load %arg2[%c1_10, %c0_11, %c0_12] : memref<16x8x4xbf16, #tpu.memory_space<vmem>>, vector<1x8x4xbf16>
    %10 = vector.shape_cast %9 : vector<1x8x4xbf16> to vector<8x4xbf16>
    %cst_13 = arith.constant dense<0.000000e+00> : vector<8x128xf32>
    %11 = tpu.matmul %10, %8, %cst_13 {dimension_numbers = #tpu.dot_dimension_numbers<[1], [0], [0], [1], [0, 0, 1, 1], [], []>} : vector<8x4xbf16>, vector<4x128xbf16>, vector<8x128xf32> -> vector<8x128xf32>
    %12 = arith.addf %6, %11 : vector<8x128xf32>
    %c0_14 = arith.constant 0 : index
    %c0_15 = arith.constant 0 : index
    %c0_16 = arith.constant 0 : index
    %c1_17 = arith.constant 1 : index
    %13 = vector.load %arg1[%c0_14, %c0_15, %c0_16, %c1_17] : memref<1x4x4x256xbf16, #tpu.memory_space<vmem>>, vector<1x1x4x128xbf16>
    %14 = vector.shape_cast %13 : vector<1x1x4x128xbf16> to vector<4x128xbf16>
    %c2 = arith.constant 2 : index
    %c0_18 = arith.constant 0 : index
    %c0_19 = arith.constant 0 : index
    %15 = vector.load %arg2[%c2, %c0_18, %c0_19] : memref<16x8x4xbf16, #tpu.memory_space<vmem>>, vector<1x8x4xbf16>
    %16 = vector.shape_cast %15 : vector<1x8x4xbf16> to vector<8x4xbf16>
    %cst_20 = arith.constant dense<0.000000e+00> : vector<8x128xf32>
    %17 = tpu.matmul %16, %14, %cst_20 {dimension_numbers = #tpu.dot_dimension_numbers<[1], [0], [0], [1], [0, 0, 1, 1], [], []>} : vector<8x4xbf16>, vector<4x128xbf16>, vector<8x128xf32> -> vector<8x128xf32>
    %18 = arith.addf %12, %17 : vector<8x128xf32>
    %c0_21 = arith.constant 0 : index
    %c1_22 = arith.constant 1 : index
    %c0_23 = arith.constant 0 : index
    %c1_24 = arith.constant 1 : index
    %19 = vector.load %arg1[%c0_21, %c1_22, %c0_23, %c1_24] : memref<1x4x4x256xbf16, #tpu.memory_space<vmem>>, vector<1x1x4x128xbf16>
    %20 = vector.shape_cast %19 : vector<1x1x4x128xbf16> to vector<4x128xbf16>
    %c3 = arith.constant 3 : index
    %c0_25 = arith.constant 0 : index
    %c0_26 = arith.constant 0 : index
    %21 = vector.load %arg2[%c3, %c0_25, %c0_26] : memref<16x8x4xbf16, #tpu.memory_space<vmem>>, vector<1x8x4xbf16>
    %22 = vector.shape_cast %21 : vector<1x8x4xbf16> to vector<8x4xbf16>
    %cst_27 = arith.constant dense<0.000000e+00> : vector<8x128xf32>
    %23 = tpu.matmul %22, %20, %cst_27 {dimension_numbers = #tpu.dot_dimension_numbers<[1], [0], [0], [1], [0, 0, 1, 1], [], []>} : vector<8x4xbf16>, vector<4x128xbf16>, vector<8x128xf32> -> vector<8x128xf32>
    %24 = arith.addf %18, %23 : vector<8x128xf32>
    %c0_28 = arith.constant 0 : index
    %c2_29 = arith.constant 2 : index
    %c0_30 = arith.constant 0 : index
    %c0_31 = arith.constant 0 : index
    %25 = vector.load %arg1[%c0_28, %c2_29, %c0_30, %c0_31] : memref<1x4x4x256xbf16, #tpu.memory_space<vmem>>, vector<1x1x4x128xbf16>
    %26 = vector.shape_cast %25 : vector<1x1x4x128xbf16> to vector<4x128xbf16>
    %c4 = arith.constant 4 : index
    %c0_32 = arith.constant 0 : index
    %c0_33 = arith.constant 0 : index
    %27 = vector.load %arg2[%c4, %c0_32, %c0_33] : memref<16x8x4xbf16, #tpu.memory_space<vmem>>, vector<1x8x4xbf16>
    %28 = vector.shape_cast %27 : vector<1x8x4xbf16> to vector<8x4xbf16>
    %cst_34 = arith.constant dense<0.000000e+00> : vector<8x128xf32>
    %29 = tpu.matmul %28, %26, %cst_34 {dimension_numbers = #tpu.dot_dimension_numbers<[1], [0], [0], [1], [0, 0, 1, 1], [], []>} : vector<8x4xbf16>, vector<4x128xbf16>, vector<8x128xf32> -> vector<8x128xf32>
    %30 = arith.addf %24, %29 : vector<8x128xf32>
    %c0_35 = arith.constant 0 : index
    %c3_36 = arith.constant 3 : index
    %c0_37 = arith.constant 0 : index
    %c0_38 = arith.constant 0 : index
    %31 = vector.load %arg1[%c0_35, %c3_36, %c0_37, %c0_38] : memref<1x4x4x256xbf16, #tpu.memory_space<vmem>>, vector<1x1x4x128xbf16>
    %32 = vector.shape_cast %31 : vector<1x1x4x128xbf16> to vector<4x128xbf16>
    %c5 = arith.constant 5 : index
    %c0_39 = arith.constant 0 : index
    %c0_40 = arith.constant 0 : index
    %33 = vector.load %arg2[%c5, %c0_39, %c0_40] : memref<16x8x4xbf16, #tpu.memory_space<vmem>>, vector<1x8x4xbf16>
    %34 = vector.shape_cast %33 : vector<1x8x4xbf16> to vector<8x4xbf16>
    %cst_41 = arith.constant dense<0.000000e+00> : vector<8x128xf32>
    %35 = tpu.matmul %34, %32, %cst_41 {dimension_numbers = #tpu.dot_dimension_numbers<[1], [0], [0], [1], [0, 0, 1, 1], [], []>} : vector<8x4xbf16>, vector<4x128xbf16>, vector<8x128xf32> -> vector<8x128xf32>
    %36 = arith.addf %30, %35 : vector<8x128xf32>
    %c0_42 = arith.constant 0 : index
    %c2_43 = arith.constant 2 : index
    %c0_44 = arith.constant 0 : index
    %c1_45 = arith.constant 1 : index
    %37 = vector.load %arg1[%c0_42, %c2_43, %c0_44, %c1_45] : memref<1x4x4x256xbf16, #tpu.memory_space<vmem>>, vector<1x1x4x128xbf16>
    %38 = vector.shape_cast %37 : vector<1x1x4x128xbf16> to vector<4x128xbf16>
    %c6 = arith.constant 6 : index
    %c0_46 = arith.constant 0 : index
    %c0_47 = arith.constant 0 : index
    %39 = vector.load %arg2[%c6, %c0_46, %c0_47] : memref<16x8x4xbf16, #tpu.memory_space<vmem>>, vector<1x8x4xbf16>
    %40 = vector.shape_cast %39 : vector<1x8x4xbf16> to vector<8x4xbf16>
    %cst_48 = arith.constant dense<0.000000e+00> : vector<8x128xf32>
    %41 = tpu.matmul %40, %38, %cst_48 {dimension_numbers = #tpu.dot_dimension_numbers<[1], [0], [0], [1], [0, 0, 1, 1], [], []>} : vector<8x4xbf16>, vector<4x128xbf16>, vector<8x128xf32> -> vector<8x128xf32>
    %42 = arith.addf %36, %41 : vector<8x128xf32>
    %c0_49 = arith.constant 0 : index
    %c3_50 = arith.constant 3 : index
    %c0_51 = arith.constant 0 : index
    %c1_52 = arith.constant 1 : index
    %43 = vector.load %arg1[%c0_49, %c3_50, %c0_51, %c1_52] : memref<1x4x4x256xbf16, #tpu.memory_space<vmem>>, vector<1x1x4x128xbf16>
    %44 = vector.shape_cast %43 : vector<1x1x4x128xbf16> to vector<4x128xbf16>
    %c7 = arith.constant 7 : index
    %c0_53 = arith.constant 0 : index
    %c0_54 = arith.constant 0 : index
    %45 = vector.load %arg2[%c7, %c0_53, %c0_54] : memref<16x8x4xbf16, #tpu.memory_space<vmem>>, vector<1x8x4xbf16>
    %46 = vector.shape_cast %45 : vector<1x8x4xbf16> to vector<8x4xbf16>
    %cst_55 = arith.constant dense<0.000000e+00> : vector<8x128xf32>
    %47 = tpu.matmul %46, %44, %cst_55 {dimension_numbers = #tpu.dot_dimension_numbers<[1], [0], [0], [1], [0, 0, 1, 1], [], []>} : vector<8x4xbf16>, vector<4x128xbf16>, vector<8x128xf32> -> vector<8x128xf32>
    %48 = arith.addf %42, %47 : vector<8x128xf32>
    %c0_56 = arith.constant 0 : index
    %c0_57 = arith.constant 0 : index
    %c0_58 = arith.constant 0 : index
    %c9 = arith.constant 9 : index
    %49 = vector.load %arg1[%c0_56, %c0_57, %c0_58, %c9] : memref<1x4x4x256xbf16, #tpu.memory_space<vmem>>, vector<1x1x4x128xbf16>
    %50 = vector.shape_cast %49 : vector<1x1x4x128xbf16> to vector<4x128xbf16>
    %c8 = arith.constant 8 : index
    %c0_59 = arith.constant 0 : index
    %c0_60 = arith.constant 0 : index
    %51 = vector.load %arg2[%c8, %c0_59, %c0_60] : memref<16x8x4xbf16, #tpu.memory_space<vmem>>, vector<1x8x4xbf16>
    %52 = vector.shape_cast %51 : vector<1x8x4xbf16> to vector<8x4xbf16>
    %cst_61 = arith.constant dense<0.000000e+00> : vector<8x128xf32>
    %53 = tpu.matmul %52, %50, %cst_61 {dimension_numbers = #tpu.dot_dimension_numbers<[1], [0], [0], [1], [0, 0, 1, 1], [], []>} : vector<8x4xbf16>, vector<4x128xbf16>, vector<8x128xf32> -> vector<8x128xf32>
    %54 = arith.addf %48, %53 : vector<8x128xf32>
    %c0_62 = arith.constant 0 : index
    %c1_63 = arith.constant 1 : index
    %c0_64 = arith.constant 0 : index
    %c9_65 = arith.constant 9 : index
    %55 = vector.load %arg1[%c0_62, %c1_63, %c0_64, %c9_65] : memref<1x4x4x256xbf16, #tpu.memory_space<vmem>>, vector<1x1x4x128xbf16>
    %56 = vector.shape_cast %55 : vector<1x1x4x128xbf16> to vector<4x128xbf16>
    %c9_66 = arith.constant 9 : index
    %c0_67 = arith.constant 0 : index
    %c0_68 = arith.constant 0 : index
    %57 = vector.load %arg2[%c9_66, %c0_67, %c0_68] : memref<16x8x4xbf16, #tpu.memory_space<vmem>>, vector<1x8x4xbf16>
    %58 = vector.shape_cast %57 : vector<1x8x4xbf16> to vector<8x4xbf16>
    %cst_69 = arith.constant dense<0.000000e+00> : vector<8x128xf32>
    %59 = tpu.matmul %58, %56, %cst_69 {dimension_numbers = #tpu.dot_dimension_numbers<[1], [0], [0], [1], [0, 0, 1, 1], [], []>} : vector<8x4xbf16>, vector<4x128xbf16>, vector<8x128xf32> -> vector<8x128xf32>
    %60 = arith.addf %54, %59 : vector<8x128xf32>
    %c0_70 = arith.constant 0 : index
    %c0_71 = arith.constant 0 : index
    %c0_72 = arith.constant 0 : index
    %c10 = arith.constant 10 : index
    %61 = vector.load %arg1[%c0_70, %c0_71, %c0_72, %c10] : memref<1x4x4x256xbf16, #tpu.memory_space<vmem>>, vector<1x1x4x128xbf16>
    %62 = vector.shape_cast %61 : vector<1x1x4x128xbf16> to vector<4x128xbf16>
    %c10_73 = arith.constant 10 : index
    %c0_74 = arith.constant 0 : index
    %c0_75 = arith.constant 0 : index
    %63 = vector.load %arg2[%c10_73, %c0_74, %c0_75] : memref<16x8x4xbf16, #tpu.memory_space<vmem>>, vector<1x8x4xbf16>
    %64 = vector.shape_cast %63 : vector<1x8x4xbf16> to vector<8x4xbf16>
    %cst_76 = arith.constant dense<0.000000e+00> : vector<8x128xf32>
    %65 = tpu.matmul %64, %62, %cst_76 {dimension_numbers = #tpu.dot_dimension_numbers<[1], [0], [0], [1], [0, 0, 1, 1], [], []>} : vector<8x4xbf16>, vector<4x128xbf16>, vector<8x128xf32> -> vector<8x128xf32>
    %66 = arith.addf %60, %65 : vector<8x128xf32>
    %c0_77 = arith.constant 0 : index
    %c1_78 = arith.constant 1 : index
    %c0_79 = arith.constant 0 : index
    %c10_80 = arith.constant 10 : index
    %67 = vector.load %arg1[%c0_77, %c1_78, %c0_79, %c10_80] : memref<1x4x4x256xbf16, #tpu.memory_space<vmem>>, vector<1x1x4x128xbf16>
    %68 = vector.shape_cast %67 : vector<1x1x4x128xbf16> to vector<4x128xbf16>
    %c11 = arith.constant 11 : index
    %c0_81 = arith.constant 0 : index
    %c0_82 = arith.constant 0 : index
    %69 = vector.load %arg2[%c11, %c0_81, %c0_82] : memref<16x8x4xbf16, #tpu.memory_space<vmem>>, vector<1x8x4xbf16>
    %70 = vector.shape_cast %69 : vector<1x8x4xbf16> to vector<8x4xbf16>
    %cst_83 = arith.constant dense<0.000000e+00> : vector<8x128xf32>
    %71 = tpu.matmul %70, %68, %cst_83 {dimension_numbers = #tpu.dot_dimension_numbers<[1], [0], [0], [1], [0, 0, 1, 1], [], []>} : vector<8x4xbf16>, vector<4x128xbf16>, vector<8x128xf32> -> vector<8x128xf32>
    %72 = arith.addf %66, %71 : vector<8x128xf32>
    %c0_84 = arith.constant 0 : index
    %c2_85 = arith.constant 2 : index
    %c0_86 = arith.constant 0 : index
    %c9_87 = arith.constant 9 : index
    %73 = vector.load %arg1[%c0_84, %c2_85, %c0_86, %c9_87] : memref<1x4x4x256xbf16, #tpu.memory_space<vmem>>, vector<1x1x4x128xbf16>
    %74 = vector.shape_cast %73 : vector<1x1x4x128xbf16> to vector<4x128xbf16>
    %c12 = arith.constant 12 : index
    %c0_88 = arith.constant 0 : index
    %c0_89 = arith.constant 0 : index
    %75 = vector.load %arg2[%c12, %c0_88, %c0_89] : memref<16x8x4xbf16, #tpu.memory_space<vmem>>, vector<1x8x4xbf16>
    %76 = vector.shape_cast %75 : vector<1x8x4xbf16> to vector<8x4xbf16>
    %cst_90 = arith.constant dense<0.000000e+00> : vector<8x128xf32>
    %77 = tpu.matmul %76, %74, %cst_90 {dimension_numbers = #tpu.dot_dimension_numbers<[1], [0], [0], [1], [0, 0, 1, 1], [], []>} : vector<8x4xbf16>, vector<4x128xbf16>, vector<8x128xf32> -> vector<8x128xf32>
    %78 = arith.addf %72, %77 : vector<8x128xf32>
    %c0_91 = arith.constant 0 : index
    %c3_92 = arith.constant 3 : index
    %c0_93 = arith.constant 0 : index
    %c9_94 = arith.constant 9 : index
    %79 = vector.load %arg1[%c0_91, %c3_92, %c0_93, %c9_94] : memref<1x4x4x256xbf16, #tpu.memory_space<vmem>>, vector<1x1x4x128xbf16>
    %80 = vector.shape_cast %79 : vector<1x1x4x128xbf16> to vector<4x128xbf16>
    %c13 = arith.constant 13 : index
    %c0_95 = arith.constant 0 : index
    %c0_96 = arith.constant 0 : index
    %81 = vector.load %arg2[%c13, %c0_95, %c0_96] : memref<16x8x4xbf16, #tpu.memory_space<vmem>>, vector<1x8x4xbf16>
    %82 = vector.shape_cast %81 : vector<1x8x4xbf16> to vector<8x4xbf16>
    %cst_97 = arith.constant dense<0.000000e+00> : vector<8x128xf32>
    %83 = tpu.matmul %82, %80, %cst_97 {dimension_numbers = #tpu.dot_dimension_numbers<[1], [0], [0], [1], [0, 0, 1, 1], [], []>} : vector<8x4xbf16>, vector<4x128xbf16>, vector<8x128xf32> -> vector<8x128xf32>
    %84 = arith.addf %78, %83 : vector<8x128xf32>
    %c0_98 = arith.constant 0 : index
    %c2_99 = arith.constant 2 : index
    %c0_100 = arith.constant 0 : index
    %c10_101 = arith.constant 10 : index
    %85 = vector.load %arg1[%c0_98, %c2_99, %c0_100, %c10_101] : memref<1x4x4x256xbf16, #tpu.memory_space<vmem>>, vector<1x1x4x128xbf16>
    %86 = vector.shape_cast %85 : vector<1x1x4x128xbf16> to vector<4x128xbf16>
    %c14 = arith.constant 14 : index
    %c0_102 = arith.constant 0 : index
    %c0_103 = arith.constant 0 : index
    %87 = vector.load %arg2[%c14, %c0_102, %c0_103] : memref<16x8x4xbf16, #tpu.memory_space<vmem>>, vector<1x8x4xbf16>
    %88 = vector.shape_cast %87 : vector<1x8x4xbf16> to vector<8x4xbf16>
    %cst_104 = arith.constant dense<0.000000e+00> : vector<8x128xf32>
    %89 = tpu.matmul %88, %86, %cst_104 {dimension_numbers = #tpu.dot_dimension_numbers<[1], [0], [0], [1], [0, 0, 1, 1], [], []>} : vector<8x4xbf16>, vector<4x128xbf16>, vector<8x128xf32> -> vector<8x128xf32>
    %90 = arith.addf %84, %89 : vector<8x128xf32>
    %c0_105 = arith.constant 0 : index
    %c3_106 = arith.constant 3 : index
    %c0_107 = arith.constant 0 : index
    %c10_108 = arith.constant 10 : index
    %91 = vector.load %arg1[%c0_105, %c3_106, %c0_107, %c10_108] : memref<1x4x4x256xbf16, #tpu.memory_space<vmem>>, vector<1x1x4x128xbf16>
    %92 = vector.shape_cast %91 : vector<1x1x4x128xbf16> to vector<4x128xbf16>
    %c15 = arith.constant 15 : index
    %c0_109 = arith.constant 0 : index
    %c0_110 = arith.constant 0 : index
    %93 = vector.load %arg2[%c15, %c0_109, %c0_110] : memref<16x8x4xbf16, #tpu.memory_space<vmem>>, vector<1x8x4xbf16>
    %94 = vector.shape_cast %93 : vector<1x8x4xbf16> to vector<8x4xbf16>
    %cst_111 = arith.constant dense<0.000000e+00> : vector<8x128xf32>
    %95 = tpu.matmul %94, %92, %cst_111 {dimension_numbers = #tpu.dot_dimension_numbers<[1], [0], [0], [1], [0, 0, 1, 1], [], []>} : vector<8x4xbf16>, vector<4x128xbf16>, vector<8x128xf32> -> vector<8x128xf32>
    %96 = arith.addf %90, %95 : vector<8x128xf32>
    %c0_112 = arith.constant 0 : index
    %c0_113 = arith.constant 0 : index
    %97 = vector.load %arg3[%c0_112, %c0_113] : memref<1x128xf32, #tpu.memory_space<vmem>>, vector<1x128xf32>
    %98 = vector.broadcast %97 : vector<1x128xf32> to vector<8x128xf32>
    %99 = arith.mulf %96, %98 : vector<8x128xf32>
    %cst_114 = arith.constant dense<0.000000e+00> : vector<8xf32>
    %100 = vector.multi_reduction <add>, %99, %cst_114 [1] : vector<8x128xf32> to vector<8xf32>
    %101 = vector.shape_cast %100 : vector<8xf32> to vector<8x1xf32>
    %102 = arith.mulf %96, %96 : vector<8x128xf32>
    %103 = vector.broadcast %97 : vector<1x128xf32> to vector<8x128xf32>
    %104 = arith.mulf %102, %103 : vector<8x128xf32>
    %cst_115 = arith.constant dense<0.000000e+00> : vector<8xf32>
    %105 = vector.multi_reduction <add>, %104, %cst_115 [1] : vector<8x128xf32> to vector<8xf32>
    %106 = vector.shape_cast %105 : vector<8xf32> to vector<8x1xf32>
    %cst_116 = arith.constant 1.562500e-02 : f32
    %107 = vector.broadcast %cst_116 : f32 to vector<8x1xf32>
    %108 = arith.mulf %101, %107 : vector<8x1xf32>
    %cst_117 = arith.constant 1.562500e-02 : f32
    %109 = vector.broadcast %cst_117 : f32 to vector<8x1xf32>
    %110 = arith.mulf %106, %109 : vector<8x1xf32>
    %111 = arith.mulf %108, %108 : vector<8x1xf32>
    %112 = arith.subf %110, %111 : vector<8x1xf32>
    %cst_118 = arith.constant 0.000000e+00 : f32
    %113 = vector.broadcast %cst_118 : f32 to vector<8x1xf32>
    %114 = arith.maximumf %112, %113 : vector<8x1xf32>
    %115 = vector.broadcast %108 : vector<8x1xf32> to vector<8x128xf32>
    %116 = arith.subf %96, %115 : vector<8x128xf32>
    %cst_119 = arith.constant 9.99999974E-6 : f32
    %117 = vector.broadcast %cst_119 : f32 to vector<8x1xf32>
    %118 = arith.addf %114, %117 : vector<8x1xf32>
    %119 = math.rsqrt %118 : vector<8x1xf32>
    %120 = vector.broadcast %119 : vector<8x1xf32> to vector<8x128xf32>
    %121 = arith.mulf %116, %120 : vector<8x128xf32>
    %cst_120 = arith.constant 0.000000e+00 : f32
    %122 = vector.broadcast %cst_120 : f32 to vector<8x128xf32>
    %123 = arith.cmpf oge, %121, %122 : vector<8x128xf32>
    %cst_121 = arith.constant 2.000000e-01 : f32
    %124 = vector.broadcast %cst_121 : f32 to vector<8x128xf32>
    %125 = arith.mulf %124, %121 : vector<8x128xf32>
    %126 = arith.select %123, %121, %125 : vector<8x128xi1>, vector<8x128xf32>
    %c0_122 = arith.constant 0 : index
    %c0_123 = arith.constant 0 : index
    %c0_124 = arith.constant 0 : index
    %127 = vector.load %arg4[%c0_122, %c0_123, %c0_124] : memref<1x8x128xf32, #tpu.memory_space<vmem>>, vector<1x8x128xf32>
    %128 = vector.shape_cast %127 : vector<1x8x128xf32> to vector<8x128xf32>
    %129 = vector.shape_cast %126 : vector<8x128xf32> to vector<1x8x128xf32>
    tpu.vector_store %arg4[%c0_122, %c0_123, %c0_124], %129 {strides = array<i32>} : memref<1x8x128xf32, #tpu.memory_space<vmem>>, vector<1x8x128xf32>,
    return
  }
  func.func @transform_0(%arg0: i32) -> (i32, i32, i32, i32) {
    %c0_i32 = arith.constant 0 : i32
    %c0_i32_0 = arith.constant 0 : i32
    %c0_i32_1 = arith.constant 0 : i32
    %c0_i32_2 = arith.constant 0 : i32
    return %arg0, %c0_i32, %c0_i32_0, %c0_i32_1 : i32, i32, i32, i32
  }
  func.func @transform_1(%arg0: i32) -> (i32, i32, i32) {
    %c0_i32 = arith.constant 0 : i32
    %c0_i32_0 = arith.constant 0 : i32
    %c0_i32_1 = arith.constant 0 : i32
    %c0_i32_2 = arith.constant 0 : i32
    return %c0_i32, %c0_i32_0, %c0_i32_1 : i32, i32, i32
  }
  func.func @transform_2(%arg0: i32) -> (i32, i32) {
    %c0_i32 = arith.constant 0 : i32
    %c0_i32_0 = arith.constant 0 : i32
    %c0_i32_1 = arith.constant 0 : i32
    return %c0_i32, %c0_i32_0 : i32, i32
  }
  func.func @transform_3(%arg0: i32) -> (i32, i32, i32) {
    %c0_i32 = arith.constant 0 : i32
    %c0_i32_0 = arith.constant 0 : i32
    %c0_i32_1 = arith.constant 0 : i32
    return %arg0, %c0_i32, %c0_i32_0 : i32, i32, i32
  }
}

</mosaic_0001>

<bundles_post_ra>
// kernel: _lambda_.1
= control target key start
LH: loop header
LB: loop body
LE: loop exit
PB: predicated region body
PF: predicated region fallthrough
CT: control target
= control target key end

     0   :  { %s860_s12 = smov 0   ;;  %s1002_s0 = inlined_call_operand.vmem [shape: bf16[2,4,4,256], index: 0, kind: input, shape index: {}]   ;;  %s1003_s1 = inlined_call_operand.vmem [shape: bf16[16,8,4], index: 1, kind: input, shape index: {}]   ;;  %s1004_s2 = inlined_call_operand.vmem [shape: f32[1,128], index: 2, kind: input, shape index: {}]   ;;  %s1005_s3 = inlined_call_operand.vmem [shape: f32[2,8,128], index: 3, kind: output, shape index: {}]  }
   0x1 LB: > { %s761_s13 = sadd.s32 4294967295, %s835_s12   ;;  %p765_p0 = scmp.ge.s32.totalorder %s835_s12, 1  ;;  %s835_s12 = sphi %s860_s12, %s13_s12  }
   0x2   : > { %p137_p1 = scmp.lt.s32.totalorder %s835_s12, 3 }
   0x4   : > { %p138_p2 = pnand %p765_p0, %p137_p1 }
   0x5   : > { %p160_p3 = scmp.lt.s32.totalorder (!%p138_p2), %s761_s13, 1  ;;  %s837_s18 = smov (!%p138_p2), 127  }
   0x6   : > { %141 = sbr.rel (%p138_p2) target bundleno = 517 (0x205), region = 32  ;;  %s838_s19 = smov (!%p138_p2), 119  }
   0x7   : > { %s839_s20 = smov (!%p138_p2), 118  }
   0xb   : > { %s1007_s13 = smov (!%p160_p3, %s761_s13), 1  ;;  %vm180_vm0 = vcmask 1041408   ;;  %v770_v38 = vld [vmem:[%s1003_s1 + $0x4] sm:$0xf]  ;;  %vm176_vm1 = vcmask 31744   ;;  %vm229_vm2 = vcmask 1039360  }
   0xc   : > { %s814_s14 = sshll.u32 %s1007_s13, 4  ;;  %v171_v41 = vld [vmem:[%s1003_s1] sm:$0xf]  ;;  %v779_v44 = vld [vmem:[%s1003_s1 + $0x10] sm:$0xf]  ;;  %vm414_vm3 = vcmask 973824  }
   0xd   : > { %s874_s17 = scalar_lea.vmem %s1002_s0, %s814_s14  ;;  %v773_v56 = vld [vmem:[%s1003_s1 + $0x8] sm:$0xf]  ;;  %v782_v57 = vld [vmem:[%s1003_s1 + $0x14] sm:$0xf]  ;;  %v776_v61 = vld [vmem:[%s1003_s1 + $0xc] sm:$0xf] }
   0xe   : > { %v216_v0 = vld [vmem:[%s874_s17] sm:$0xf]  ;;  %v775_v1 = vld [vmem:[%s874_s17 + $0x4] sm:$0xf]  ;;  %v784_v4 = vld [vmem:[%s874_s17 + $0x8] sm:$0xf] }
   0xf   : > { %220 = vst [vmem:[#allocation1] ss:$4 sm:$0xff] %v216_v0  ;;  %v787_v7 = vld [vmem:[%s874_s17 + $0xc] sm:$0xf]  ;;  %v401_v10 = vld [vmem:[%s874_s17] sm:$0xf] }
  0x10   : > { %v792_v13 = vld [vmem:[%s874_s17 + $0x4] sm:$0xf]  ;;  %v470_v16 = vld [vmem:[%s874_s17] sm:$0xf]  ;;  %v800_v22 = vld [vmem:[%s874_s17 + $0x8] sm:$0xf] }
  0x11   : > { %v797_v19 = vld [vmem:[%s874_s17 + $0x4] sm:$0xf]  ;;  %v803_v25 = vld [vmem:[%s874_s17 + $0xc] sm:$0xf]  ;;  %v806_v28 = vld [vmem:[%s874_s17 + $0x8] sm:$0xf] }
  0x12   : > { %v809_v31 = vld [vmem:[%s874_s17 + $0xc] sm:$0xf]  ;;  %v769_v36 = vld [vmem:[%s874_s17 + $0x4] sm:$0x3]  ;;  %v170_v39 = vld [vmem:[%s874_s17] sm:$0x3] }
  0x13   : > { %v182_v37 = vsel %vm180_vm0, %v769_v36, 0  ;;  %v201_v40 = vsel %vm180_vm0, %v170_v39, 0  ;;  %v778_v42 = vld [vmem:[%s874_s17 + $0x8] sm:$0x3]  ;;  %v781_v53 = vld [vmem:[%s874_s17 + $0xc] sm:$0x3] }
  0x14   : > { %191 = vmatpush.bf16.msra.mxu0 %v182_v37  ;;  %210 = vmatpush.bf16.msra.mxu1 %v201_v40  ;;  %v293_v43 = vsel %vm180_vm0, %v778_v42, 0  ;;  %v317_v55 = vsel %vm180_vm0, %v781_v53, 0  ;;  %vm483_vm4 = vcmask 965632   ;;  %v804_v42 = vld [vmem:[%s1003_s1 + $0x34] sm:$0xf]  ;;  %s768_s30 = sshll.u32 %s1007_s13, 3 }
  0x15   : > { %s168_s6 = scalar_lea.vmem %s1005_s3, %s768_s30 }
  0x16   : > { %v221_v2 = vld.sshfl [vmem:[#allocation1] sm:$0xff pattern:$0x73625140]  ;;  %v223_v3 = vld.sshfl [vmem:[#allocation1 + $0x8] sm:$0xff pattern:$0x73625140] }
  0x17   : > { %225 = vrot.lane.b32.xlu0 %v221_v2, %s837_s18  ;;  %255 = vst [vmem:[#allocation1] ss:$4 sm:$0xff] %v775_v1  ;;  %771 = vmatmul.msk.bf16.vlgmr.msra.gmra.mxu0 %vm176_vm1, %v770_v38 }
  0x18   : > { %772 = vmatmul.msk.bf16.vlgmr.msra.gmra.mxu1 %vm176_vm1, %v171_v41  ;;  %302 = vmatpush.bf16.msrb.mxu0 %v293_v43  ;;  %v810_v43 = vld [vmem:[%s1003_s1 + $0x3c] sm:$0xf] }
  0x19   : > { %326 = vmatpush.bf16.msrb.mxu1 %v317_v55 }
  0x1e   : > { %v256_v5 = vld.sshfl [vmem:[#allocation1] sm:$0xff pattern:$0x73625140]  ;;  %v258_v6 = vld.sshfl [vmem:[#allocation1 + $0x8] sm:$0xff pattern:$0x73625140] }
  0x1f   : > { %260 = vrot.lane.b32.xlu1 %v256_v5, %s837_s18  ;;  %227 = vrot.lane.b32.xlu0 %v223_v3, %s837_s18  ;;  %337 = vst [vmem:[#allocation1] ss:$4 sm:$0xff] %v784_v4  ;;  %v785_v3 = vld [vmem:[%s1003_s1 + $0x18] sm:$0xf] }
  0x26   : > { %v338_v8 = vld.sshfl [vmem:[#allocation1] sm:$0xff pattern:$0x73625140]  ;;  %v340_v9 = vld.sshfl [vmem:[#allocation1 + $0x8] sm:$0xff pattern:$0x73625140] }
  0x27   : > { %262 = vrot.lane.b32.xlu1 %v258_v6, %s837_s18  ;;  %371 = vst [vmem:[#allocation1] ss:$4 sm:$0xff] %v787_v7  ;;  %342 = vrot.lane.b32.xlu2 %v338_v8, %s837_s18  ;;  %v788_v7 = vld [vmem:[%s1003_s1 + $0x1c] sm:$0xf]  ;;  %v790_v8 = vld [vmem:[%s1003_s1 + $0x20] sm:$0xf] }
  0x28   : > { %780 = vmatmul.msk.bf16.vlgmr.msrb.gmra.mxu0 %vm176_vm1, %v779_v44  ;;  %783 = vmatmul.msk.bf16.vlgmr.msrb.gmra.mxu1 %vm176_vm1, %v782_v57 }
  0x2e   : > { %v374_v11 = vld.sshfl [vmem:[#allocation1 + $0x8] sm:$0xff pattern:$0x73625140]  ;;  %v372_v12 = vld.sshfl [vmem:[#allocation1] sm:$0xff pattern:$0x73625140] }
  0x2f   : > { %378 = vrot.lane.b32.xlu1 %v374_v11, %s837_s18  ;;  %376 = vrot.lane.b32.xlu0 %v372_v12, %s837_s18  ;;  %405 = vst [vmem:[#allocation1] ss:$4 sm:$0xff] %v401_v10 }
  0x30   : > { %344 = vrot.lane.b32.xlu2 %v340_v9, %s837_s18 }
  0x36   : > { %v408_v14 = vld.sshfl [vmem:[#allocation1 + $0x8] sm:$0xff pattern:$0x73625140]  ;;  %v406_v15 = vld.sshfl [vmem:[#allocation1] sm:$0xff pattern:$0x73625140] }
  0x37   : > { %410 = vrot.lane.b32.xlu1 %v406_v15, %s838_s19  ;;  %440 = vst [vmem:[#allocation1] ss:$4 sm:$0xff] %v792_v13  ;;  %v793_v13 = vld [vmem:[%s1003_s1 + $0x24] sm:$0xf] }
  0x38   : > { %412 = vrot.lane.b32.xlu2 %v408_v14, %s838_s19 }
  0x3e   : > { %v443_v17 = vld.sshfl [vmem:[#allocation1 + $0x8] sm:$0xff pattern:$0x73625140]  ;;  %v441_v18 = vld.sshfl [vmem:[#allocation1] sm:$0xff pattern:$0x73625140] }
  0x3f   : > { %447 = vrot.lane.b32.xlu0 %v443_v17, %s838_s19  ;;  %474 = vst [vmem:[#allocation1] ss:$4 sm:$0xff] %v470_v16 }
  0x40   : > { %445 = vrot.lane.b32.xlu2 %v441_v18, %s838_s19  ;;  %v795_v18 = vld [vmem:[%s1003_s1 + $0x28] sm:$0xf] }
  0x46   : > { %v477_v20 = vld.sshfl [vmem:[#allocation1 + $0x8] sm:$0xff pattern:$0x73625140]  ;;  %v475_v21 = vld.sshfl [vmem:[#allocation1] sm:$0xff pattern:$0x73625140] }
  0x47   : > { %481 = vrot.lane.b32.xlu0 %v477_v20, %s839_s20  ;;  %509 = vst [vmem:[#allocation1] ss:$4 sm:$0xff] %v797_v19 }
  0x48   : > { %479 = vrot.lane.b32.xlu2 %v475_v21, %s839_s20 }
  0x4e   : > { %v512_v23 = vld.sshfl [vmem:[#allocation1 + $0x8] sm:$0xff pattern:$0x73625140]  ;;  %v510_v24 = vld.sshfl [vmem:[#allocation1] sm:$0xff pattern:$0x73625140] }
  0x4f   : > { %516 = vrot.lane.b32.xlu1 %v512_v23, %s839_s20  ;;  %514 = vrot.lane.b32.xlu0 %v510_v24, %s839_s20  ;;  %543 = vst [vmem:[#allocation1] ss:$4 sm:$0xff] %v800_v22  ;;  %v798_v23 = vld [vmem:[%s1003_s1 + $0x2c] sm:$0xf] }
  0x56   : > { %v546_v26 = vld.sshfl [vmem:[#allocation1 + $0x8] sm:$0xff pattern:$0x73625140]  ;;  %v544_v27 = vld.sshfl [vmem:[#allocation1] sm:$0xff pattern:$0x73625140] }
  0x57   : > { %550 = vrot.lane.b32.xlu1 %v546_v26, %s838_s19  ;;  %548 = vrot.lane.b32.xlu0 %v544_v27, %s838_s19  ;;  %577 = vst [vmem:[#allocation1] ss:$4 sm:$0xff] %v803_v25 }
  0x5e   : > { %v578_v29 = vld.sshfl [vmem:[#allocation1] sm:$0xff pattern:$0x73625140]  ;;  %v580_v30 = vld.sshfl [vmem:[#allocation1 + $0x8] sm:$0xff pattern:$0x73625140] }
  0x5f   : > { %611 = vst [vmem:[#allocation1] ss:$4 sm:$0xff] %v806_v28 }
  0x66   : > { %v612_v32 = vld.sshfl [vmem:[#allocation1] sm:$0xff pattern:$0x73625140]  ;;  %v614_v33 = vld.sshfl [vmem:[#allocation1 + $0x8] sm:$0xff pattern:$0x73625140] }
  0x67   : > { %616 = vrot.lane.b32.xlu1 %v612_v32, %s839_s20  ;;  %645 = vst [vmem:[#allocation1] ss:$4 sm:$0xff] %v809_v31  ;;  %618 = vrot.lane.b32.xlu2 %v614_v33, %s839_s20 }
  0x6e   : > { %v648_v34 = vld.sshfl [vmem:[#allocation1 + $0x8] sm:$0xff pattern:$0x73625140]  ;;  %v646_v35 = vld.sshfl [vmem:[#allocation1] sm:$0xff pattern:$0x73625140] }
  0x6f   : > { %582 = vrot.lane.b32.xlu1 %v578_v29, %s838_s19  ;;  %652 = vrot.lane.b32.xlu0 %v648_v34, %s839_s20  ;;  %v801_v29 = vld [vmem:[%s1003_s1 + $0x30] sm:$0xf]  ;;  %v807_v34 = vld [vmem:[%s1003_s1 + $0x38] sm:$0xf] }
  0x70   : > { %650 = vrot.lane.b32.xlu2 %v646_v35, %s839_s20 }
  0x78   : > { %584 = vrot.lane.b32.xlu2 %v580_v30, %s838_s19 }
  0x81   : > { %v343_v45 = vpop.permute.xlu2 %342 }
  0x89   : > { %v226_v46 = vpop.permute.xlu0 %225 }
  0x8a   : > { %v345_v47 = vpop.permute.xlu2 %344 }
  0x8b   : > { %v346_v48 = vsel %vm229_vm2, %v343_v45, %v345_v47 }
  0x8c   : > { %v351_v52 = vsel %vm180_vm0, %v346_v48, 0 }
  0x91   : > { %v261_v49 = vpop.permute.xlu1 %260  ;;  %v228_v50 = vpop.permute.xlu0 %227 }
  0x92   : > { %v230_v51 = vsel %vm229_vm2, %v226_v46, %v228_v50  ;;  %v413_v1 = vpop.permute.xlu2 %412 }
  0x93   : > { %v235_v54 = vsel %vm180_vm0, %v230_v51, 0 }
  0x94   : > { %244 = vmatpush.bf16.msra.mxu2 %v235_v54  ;;  %v193_v44 = vpop.f32.mrf.mxu0 }
  0x95   : > { %v212_v46 = vpop.f32.mrf.mxu1 }
  0x96   : > { %v213_v47 = vadd.f32 %v212_v46, %v193_v44 }
  0x97   : > { %774 = vmatmul.msk.bf16.vlgmr.msra.gmra.mxu2 %vm176_vm1, %v773_v56 }
  0x98   : > { %360 = vmatpush.bf16.msrb.mxu2 %v351_v52 }
  0x99   : > { %v263_v58 = vpop.permute.xlu1 %262 }
  0x9a   : > { %v264_v59 = vsel %vm229_vm2, %v261_v49, %v263_v58  ;;  %v446_v9 = vpop.permute.xlu2 %445 }
  0x9b   : > { %v269_v60 = vsel %vm180_vm0, %v264_v59, 0 }
  0x9c   : > { %278 = vmatpush.bf16.msra.mxu3 %v269_v60  ;;  %v195_v45 = vpop.f32.mrf.mxu0 }
  0x9d   : > { %v214_v49 = vpop.f32.mrf.mxu1 }
  0x9f   : > { %777 = vmatmul.msk.bf16.vlgmr.msra.gmra.mxu3 %vm176_vm1, %v776_v61 }
  0xa1   : > { %v379_v62 = vpop.permute.xlu1 %378  ;;  %v377_v63 = vpop.permute.xlu0 %376 }
  0xa2   : > { %v380_v0 = vsel %vm229_vm2, %v377_v63, %v379_v62  ;;  %v480_v14 = vpop.permute.xlu2 %479 }
  0xa3   : > { %v385_v2 = vsel %vm180_vm0, %v380_v0, 0 }
  0xa4   : > { %394 = vmatpush.bf16.msrb.mxu3 %v385_v2 }
  0xa5   : > { %v304_v48 = vpop.f32.mrf.mxu0  ;;  %v328_v51 = vpop.f32.mrf.mxu1 }
  0xa7   : > { %786 = vmatmul.msk.bf16.vlgmr.msrb.gmra.mxu2 %vm176_vm1, %v785_v3 }
  0xa9   : > { %v411_v4 = vpop.permute.xlu1 %410 }
  0xaa   : > { %v415_v5 = vsel %vm414_vm3, %v411_v4, %v413_v1 }
  0xab   : > { %v420_v6 = vsel %vm180_vm0, %v415_v5, 0 }
  0xac   : > { %429 = vmatpush.bf16.msra.mxu0 %v420_v6 }
  0xad   : > { %v306_v50 = vpop.f32.mrf.mxu0  ;;  %v330_v53 = vpop.f32.mrf.mxu1 }
  0xaf   : > { %789 = vmatmul.msk.bf16.vlgmr.msrb.gmra.mxu3 %vm176_vm1, %v788_v7  ;;  %791 = vmatmul.msk.bf16.vlgmr.msra.gmra.mxu0 %vm176_vm1, %v790_v8 }
  0xb1   : > { %v448_v10 = vpop.permute.xlu0 %447 }
  0xb2   : > { %v449_v11 = vsel %vm414_vm3, %v446_v9, %v448_v10 }
  0xb3   : > { %v454_v12 = vsel %vm180_vm0, %v449_v11, 0 }
  0xb4   : > { %463 = vmatpush.bf16.msra.mxu1 %v454_v12 }
  0xb7   : > { %794 = vmatmul.msk.bf16.vlgmr.msra.gmra.mxu1 %vm176_vm1, %v793_v13 }
  0xb9   : > { %v482_v15 = vpop.permute.xlu0 %481 }
  0xba   : > { %v484_v16 = vsel %vm483_vm4, %v480_v14, %v482_v15 }
  0xbb   : > { %v489_v17 = vsel %vm180_vm0, %v484_v16, 0 }
  0xbc   : > { %498 = vmatpush.bf16.msra.mxu2 %v489_v17 }
  0xbf   : > { %796 = vmatmul.msk.bf16.vlgmr.msra.gmra.mxu2 %vm176_vm1, %v795_v18 }
  0xc1   : > { %v517_v19 = vpop.permute.xlu1 %516  ;;  %v515_v20 = vpop.permute.xlu0 %514 }
  0xc2   : > { %v518_v21 = vsel %vm483_vm4, %v515_v20, %v517_v19  ;;  %v619_v27 = vpop.permute.xlu2 %618 }
  0xc3   : > { %v523_v22 = vsel %vm180_vm0, %v518_v21, 0 }
  0xc4   : > { %532 = vmatpush.bf16.msra.mxu3 %v523_v22  ;;  %v826_v22 = vld [vmem:[%s1004_s2] ss:$0 sm:$0xff] }
  0xc7   : > { %799 = vmatmul.msk.bf16.vlgmr.msra.gmra.mxu3 %vm176_vm1, %v798_v23 }
  0xc9   : > { %v551_v24 = vpop.permute.xlu1 %550  ;;  %v549_v25 = vpop.permute.xlu0 %548 }
  0xca   : > { %v552_v26 = vsel %vm414_vm3, %v549_v25, %v551_v24  ;;  %v651_v30 = vpop.permute.xlu2 %650 }
  0xcb   : > { %v557_v28 = vsel %vm180_vm0, %v552_v26, 0 }
  0xcc   : > { %566 = vmatpush.bf16.msrb.mxu0 %v557_v28 }
  0xcf   : > { %802 = vmatmul.msk.bf16.vlgmr.msrb.gmra.mxu0 %vm176_vm1, %v801_v29 }
  0xd2   : > { %v585_v35 = vpop.permute.xlu2 %584 }
  0xd9   : > { %v617_v31 = vpop.permute.xlu1 %616 }
  0xda   : > { %v620_v32 = vsel %vm483_vm4, %v617_v31, %v619_v27 }
  0xdb   : > { %v625_v33 = vsel %vm180_vm0, %v620_v32, 0 }
  0xdc   : > { %634 = vmatpush.bf16.msrb.mxu2 %v625_v33 }
  0xdf   : > { %808 = vmatmul.msk.bf16.vlgmr.msrb.gmra.mxu2 %vm176_vm1, %v807_v34 }
  0xe1   : > { %v583_v36 = vpop.permute.xlu1 %582  ;;  %v653_v37 = vpop.permute.xlu0 %652 }
  0xe2   : > { %v654_v38 = vsel %vm483_vm4, %v651_v30, %v653_v37  ;;  %v586_v39 = vsel %vm414_vm3, %v583_v36, %v585_v35 }
  0xe3   : > { %v659_v40 = vsel %vm180_vm0, %v654_v38, 0  ;;  %v591_v41 = vsel %vm180_vm0, %v586_v39, 0 }
  0xe4   : > { %600 = vmatpush.bf16.msrb.mxu1 %v591_v41  ;;  %668 = vmatpush.bf16.msrb.mxu3 %v659_v40 }
  0xe7   : > { %805 = vmatmul.msk.bf16.vlgmr.msrb.gmra.mxu1 %vm176_vm1, %v804_v42  ;;  %811 = vmatmul.msk.bf16.vlgmr.msrb.gmra.mxu3 %vm176_vm1, %v810_v43 }
 0x11a   : > { %v246_v52 = vpop.f32.mrf.mxu2 }
 0x11b   : > { %v250_v54 = vadd.f32 %v246_v52, %v213_v47 }
 0x122   : > { %v280_v55 = vpop.f32.mrf.mxu3  ;;  %v248_v56 = vpop.f32.mrf.mxu2 }
 0x123   : > { %v284_v57 = vadd.f32 %v280_v55, %v250_v54 }
 0x125   : > { %v308_v58 = vadd.f32 %v304_v48, %v284_v57 }
 0x127   : > { %v332_v59 = vadd.f32 %v328_v51, %v308_v58 }
 0x12a   : > { %v282_v60 = vpop.f32.mrf.mxu3  ;;  %v362_v61 = vpop.f32.mrf.mxu2 }
 0x12b   : > { %v366_v9 = vadd.f32 %v362_v61, %v332_v59 }
 0x12c   : > { %v431_v62 = vpop.f32.mrf.mxu0 }
 0x132   : > { %v396_v63 = vpop.f32.mrf.mxu3  ;;  %v364_v0 = vpop.f32.mrf.mxu2 }
 0x133   : > { %v400_v10 = vadd.f32 %v396_v63, %v366_v9 }
 0x134   : > { %v433_v1 = vpop.f32.mrf.mxu0  ;;  %v465_v2 = vpop.f32.mrf.mxu1 }
 0x135   : > { %v435_v13 = vadd.f32 %v431_v62, %v400_v10 }
 0x137   : > { %v469_v14 = vadd.f32 %v465_v2, %v435_v13 }
 0x13a   : > { %v398_v3 = vpop.f32.mrf.mxu3 }
 0x13c   : > { %v467_v4 = vpop.f32.mrf.mxu1 }
 0x142   : > { %v500_v5 = vpop.f32.mrf.mxu2 }
 0x143   : > { %v504_v15 = vadd.f32 %v500_v5, %v469_v14 }
 0x14a   : > { %v534_v6 = vpop.f32.mrf.mxu3  ;;  %v502_v7 = vpop.f32.mrf.mxu2 }
 0x14b   : > { %v538_v16 = vadd.f32 %v534_v6, %v504_v15 }
 0x14c   : > { %v568_v8 = vpop.f32.mrf.mxu0 }
 0x14d   : > { %v572_v18 = vadd.f32 %v568_v8, %v538_v16 }
 0x152   : > { %v536_v11 = vpop.f32.mrf.mxu3 }
 0x154   : > { %v570_v12 = vpop.f32.mrf.mxu0 }
 0x162   : > { %v636_v17 = vpop.f32.mrf.mxu2 }
 0x164   : > { %v602_v19 = vpop.f32.mrf.mxu1 }
 0x165   : > { %v606_v20 = vadd.f32 %v602_v19, %v572_v18 }
 0x167   : > { %v640_v21 = vadd.f32 %v636_v17, %v606_v20 }
 0x16a   : > { %v670_v23 = vpop.f32.mrf.mxu3  ;;  %v638_v24 = vpop.f32.mrf.mxu2 }
 0x16b   : > { %v674_v25 = vadd.f32 %v670_v23, %v640_v21 }
 0x16c   : > { %v604_v26 = vpop.f32.mrf.mxu1 }
 0x16d   : > { %v679_v27 = vmul.f32 %v826_v22, %v674_v25  ;;  %v682_v28 = vmul.f32 %v674_v25, %v674_v25 }
 0x16f   : > { %680 = vadd.xlane.f32.xlu0 %v679_v27  ;;  %v683_v29 = vmul.f32 %v826_v22, %v682_v28 }
 0x171   : > { %684 = vadd.xlane.f32.xlu1 %v683_v29 }
 0x172   : > { %v672_v30 = vpop.f32.mrf.mxu3 }
 0x1e2   : > { %v681_v31 = vpop.xlane.xlu0 %680 }
 0x1e3   : > { %v686_v32 = vmul.f32 0.015625, %v681_v31 }
 0x1e4   : > { %v685_v33 = vpop.xlane.xlu1 %684 }
 0x1e5   : > { %v688_v34 = vmul.f32 %v686_v32, %v686_v32  ;;  %v687_v35 = vmul.f32 0.015625, %v685_v33  ;;  %v691_v45 = vsub.f32 %v674_v25, %v686_v32 }
 0x1e7   : > { %v689_v36 = vsub.f32 %v687_v35, %v688_v34 }
 0x1e9   : > { %v690_v37 = vmax.f32 %v689_v36, 0.0 }
 0x1eb   : > { %v692_v38 = vadd.f32 1e-05, %v690_v37 }
 0x1ed   : > { %827 = vrsqrt.f32 %v692_v38  ;;  %vm699_vm6 = vweird.f32 %v692_v38 }
 0x1f3   : > { %v828_v39 = vpop.eup %827 }
 0x1f4   : > { %v694_v40 = vmul.f32 %v828_v39, %v692_v38  ;;  %vm700_vm5 = vweird.f32 %v828_v39 }
 0x1f5   : > { %vm701_vm7 = vmor %vm699_vm6, %vm700_vm5 }
 0x1f6   : > { %v695_v41 = vmul.f32 %v828_v39, %v694_v40 }
 0x1f8   : > { %v696_v42 = vmul.f32 0.5, %v695_v41 }
 0x1fa   : > { %v697_v43 = vsub.f32 1.5, %v696_v42 }
 0x1fc   : > { %v698_v44 = vmul.f32 %v828_v39, %v697_v43 }
 0x1fe   : > { %v702_v46 = vsel %vm701_vm7, %v828_v39, %v698_v44 }
 0x1ff   : > { %v703_v47 = vmul.f32 %v702_v46, %v691_v45 }
 0x201   : > { %vm704_vm8 = vcmp.ge.f32.partialorder %v703_v47, 0.0  ;;  %v705_v48 = vmul.f32 0.2, %v703_v47 }
 0x203   : > { %v706_v49 = vsel %vm704_vm8, %v703_v47, %v705_v48 }
 0x204   : > { %707 = vst [vmem:[%s168_s6] sm:$0xff] %v706_v49 }
 0x205 PF: > { %s13_s12 = sadd.s32 1, %s835_s12  }
 0x206   : > { %p10_p4 = scmp.ge.s32.totalorder %s13_s12, 4  }
 0x208   :  { %12 = sbr.rel (!%p10_p4) target bundleno = 1 (0x1), region = 80 }

</bundles_post_ra>
